<compile_context>
chip_gen: v7x
topology: tpu7x:2x2x1
jax: 0.10.0
libtpu: 0.0.40
codegen_flags: <defaults>
</compile_context>

<pallas_src>
import jax
import jax.numpy as jnp
from jax import lax
from jax.experimental import pallas as pl
from jax.experimental.pallas import tpu as pltpu

_INV_SQRT2 = 0.7071067811865476
# smallest f32 "interior" margin: 2^-23; 1 - 2^-23 is exactly representable.
_EPS = 1.1920929e-07


def _gaussian_cdf_kernel(x_ref, o_ref):
    # Elementwise standard-normal CDF on the current (block_rows, lane_width) tile.
    x = x_ref[...]
    z = 0.5 * (1.0 + lax.erf(x * jnp.float32(_INV_SQRT2)))
    # Keep strictly inside (0, 1) (destructor outputs live in the open unit cube).
    eps = jnp.float32(_EPS)
    z = jnp.minimum(jnp.maximum(z, eps), jnp.float32(1.0) - eps)
    o_ref[...] = z


def _round_up(a, b):
    return ((a + b - 1) // b) * b


def gaussian_cdf(x, y=None, *, lane_width=1024, block_rows=512):
    """Pallas forward pass of GaussianCDF: Phi(x) elementwise. `y` is ignored."""
    del y  # transform() never uses y
    orig_shape = x.shape
    x32 = jnp.asarray(x, dtype=jnp.float32)  # cast BEFORE the kernel: f32 DMA only
    total = int(x32.size)

    # Flatten to a lane-dense slab: (rows_padded, lane_width), lane_width % 128 == 0.
    L = lane_width
    rows = pl.cdiv(total, L)
    rows8 = _round_up(rows, 8)
    br = min(block_rows, rows8)           # both multiples of 8 -> br multiple of 8
    rows_padded = _round_up(rows8, br)
    padded_total = rows_padded * L

    flat = x32.reshape(-1)
    if padded_total != total:
        flat = jnp.concatenate(
            [flat, jnp.zeros((padded_total - total,), dtype=jnp.float32)]
        )
    slab = flat.reshape(rows_padded, L)

    grid = (rows_padded // br,)
    out = pl.pallas_call(
        _gaussian_cdf_kernel,
        out_shape=jax.ShapeDtypeStruct((rows_padded, L), jnp.float32),
        grid=grid,
        in_specs=[pl.BlockSpec((br, L), lambda i: (i, 0))],
        out_specs=pl.BlockSpec((br, L), lambda i: (i, 0)),
        compiler_params=pltpu.CompilerParams(
            dimension_semantics=("parallel",)
        ),
    )(slab)

    return out.reshape(-1)[:total].reshape(orig_shape)


def gaussian_cdf_ref(x):
    return 0.5 * (1.0 + lax.erf(jnp.asarray(x, jnp.float32) * _INV_SQRT2))


if __name__ == "__main__":
    key = jax.random.PRNGKey(0)

    # Small scikit-learn-style matrix: 64 samples x 128 features.
    x = jax.random.normal(key, (64, 128), dtype=jnp.float32) * 1.5
    # Inject extreme tails to exercise the open-interval clamp.
    x = x.at[0, 0].set(-12.0).at[0, 1].set(12.0)

    z = gaussian_cdf(x, None)
    jax.block_until_ready(z)

    z_ref = gaussian_cdf_ref(x)
    assert z.shape == x.shape and z.dtype == jnp.float32
    assert jnp.max(jnp.abs(z - z_ref)) < 1e-5
    assert jnp.all(z > 0.0) and jnp.all(z < 1.0)

    # Ragged shape (exercises the cdiv/padding path).
    x2 = jax.random.normal(jax.random.PRNGKey(1), (10, 7), dtype=jnp.float32)
    z2 = gaussian_cdf(x2)
    jax.block_until_ready(z2)
    assert z2.shape == x2.shape
    assert jnp.max(jnp.abs(z2 - gaussian_cdf_ref(x2))) < 1e-5
    assert jnp.all(z2 > 0.0) and jnp.all(z2 < 1.0)

    print("KERNEL_OK")
</pallas_src>

<mosaic_0001>
module attributes {stable_mosaic.version = 11 : i64} {
  func.func @_gaussian_cdf_kernel(%arg0: i32, %arg1: memref<8x1024xf32, #tpu.memory_space<vmem>>, %arg2: memref<8x1024xf32, #tpu.memory_space<vmem>>) attributes {dimension_semantics = [#tpu.dimension_semantics<parallel>], iteration_bounds = array<i64: 1>, scalar_prefetch = 0 : i64, scratch_operands = 0 : i64, tpu.core_type = #tpu.core_type<tc>, window_params = [{transform_indices = @transform_0, window_bounds = array<i64: 8, 1024>}, {transform_indices = @transform_1, window_bounds = array<i64: 8, 1024>}]} {
    %c0 = arith.constant 0 : index
    %c0_0 = arith.constant 0 : index
    %0 = vector.load %arg1[%c0, %c0_0] : memref<8x1024xf32, #tpu.memory_space<vmem>>, vector<8x1024xf32>
    %cst = arith.constant 0.707106769 : f32
    %1 = vector.broadcast %cst : f32 to vector<8x1024xf32>
    %2 = arith.mulf %0, %1 : vector<8x1024xf32>
    %3 = math.erf %2 : vector<8x1024xf32>
    %cst_1 = arith.constant 1.000000e+00 : f32
    %4 = vector.broadcast %cst_1 : f32 to vector<8x1024xf32>
    %5 = arith.addf %4, %3 : vector<8x1024xf32>
    %cst_2 = arith.constant 5.000000e-01 : f32
    %6 = vector.broadcast %cst_2 : f32 to vector<8x1024xf32>
    %7 = arith.mulf %6, %5 : vector<8x1024xf32>
    %cst_3 = arith.constant 1.1920929E-7 : f32
    %8 = vector.broadcast %cst_3 : f32 to vector<8x1024xf32>
    %9 = arith.maximumf %7, %8 : vector<8x1024xf32>
    %cst_4 = arith.constant 1.000000e+00 : f32
    %cst_5 = arith.constant 1.1920929E-7 : f32
    %10 = arith.subf %cst_4, %cst_5 : f32
    %11 = vector.broadcast %10 : f32 to vector<8x1024xf32>
    %12 = arith.minimumf %9, %11 : vector<8x1024xf32>
    %c0_6 = arith.constant 0 : index
    %c0_7 = arith.constant 0 : index
    %13 = vector.load %arg2[%c0_6, %c0_7] : memref<8x1024xf32, #tpu.memory_space<vmem>>, vector<8x1024xf32>
    tpu.vector_store %arg2[%c0_6, %c0_7], %12 {strides = array<i32>} : memref<8x1024xf32, #tpu.memory_space<vmem>>, vector<8x1024xf32>,
    return
  }
  func.func @transform_0(%arg0: i32) -> (i32, i32) {
    %c0_i32 = arith.constant 0 : i32
    %c0_i32_0 = arith.constant 0 : i32
    return %arg0, %c0_i32 : i32, i32
  }
  func.func @transform_1(%arg0: i32) -> (i32, i32) {
    %c0_i32 = arith.constant 0 : i32
    %c0_i32_0 = arith.constant 0 : i32
    return %arg0, %c0_i32 : i32, i32
  }
}

</mosaic_0001>

<bundles_post_ra>
// kernel: tpu_custom_call.1
= control target key start
LH: loop header
LB: loop body
LE: loop exit
PB: predicated region body
PF: predicated region fallthrough
CT: control target
= control target key end

     0   :  { %6 = vsyncpa [#allocation3], 0  ;;  %s202_s0 = inlined_call_operand.hbm [shape: f32[8,1024], index: 0, kind: input, shape index: {}]   ;;  %s203_s1 = inlined_call_operand.hbm [shape: f32[8,1024], index: 1, kind: output, shape index: {}]  }
   0x1   :  { %7 = vsyncpa [#allocation4], 0  ;;  %s166_s6 = smov [#allocation2]   ;;  %s118_s10 = scalar_lea.hbm %s202_s0, 1024 }
   0x2   :  { %s14_s7 = sshll.u32 %s166_s6, 4  ;;  %p119_p0 = scmp.ne.s32.totalorder %s202_s0, %s118_s10  ;;  %s15_s7 = int_to_ptr.vmem [resolvable:$true] %s14_s7 }
   0x3   :  { %p122_p1 = scmp.lt.u32.totalorder %s118_s10, %s202_s0 }
   0x5   :  { %p124_p2 = pnand %p122_p1, %p119_p0 }
   0x7   :  { %127 = shalt.err (!%p124_p2)
}
   0x8   :  { %s128_s15 = scalar_lea.vmem %s15_s7, 1024  ;;  %p133_p4 = scmp.lt.s32.totalorder %s15_s7, %s15_s7 }
   0x9   :  { %p129_p3 = scmp.ne.s32.totalorder %s15_s7, %s128_s15  ;;  %p134_p5 = scmp.lt.s32.totalorder %s128_s15, %s128_s15 }
   0xb   :  { %p135_p6 = por %p134_p5, %p133_p4 }
   0xd   :  { %p136_p7 = pnand %p135_p6, %p129_p3 }
   0xf   :  { %139 = shalt.err (!%p136_p7)
}
  0x10   :  { %17 = dma.hbm_to_vmem [thread:$0]  %s202_s0, 1024, %s15_s7, [#allocation3]  }
  0x11   :  { %162 = dma.done.wait [#allocation3], 1024  }
  0x12   :  { %163 = vsyncadd [#allocation3], 4294966272  ;;  %v21_v0 = vld [vmem:[#allocation2] sm:$0xff]  ;;  %v22_v1 = vld [vmem:[#allocation2 + $0x8] sm:$0xff]  ;;  %s167_s0 = smov [#allocation5]  }
  0x13   :  { %v23_v2 = vld [vmem:[#allocation2 + $0x10] sm:$0xff]  ;;  %v29_v3 = vmul.f32 0.70710677, %v21_v0  ;;  %v30_v4 = vmul.f32 0.70710677, %v22_v1  ;;  %v24_v6 = vld [vmem:[#allocation2 + $0x18] sm:$0xff] }
  0x14   :  { %v31_v5 = vmul.f32 0.70710677, %v23_v2  ;;  %v25_v7 = vld [vmem:[#allocation2 + $0x20] sm:$0xff]  ;;  %v26_v8 = vld [vmem:[#allocation2 + $0x28] sm:$0xff]  ;;  %v32_v9 = vmul.f32 0.70710677, %v24_v6 }
  0x15   :  { %102 = verf.f32 %v29_v3  ;;  %v33_v10 = vmul.f32 0.70710677, %v25_v7  ;;  %v34_v11 = vmul.f32 0.70710677, %v26_v8  ;;  %v27_v12 = vld [vmem:[#allocation2 + $0x30] sm:$0xff]  ;;  %v28_v13 = vld [vmem:[#allocation2 + $0x38] sm:$0xff] }
  0x16   :  { %104 = verf.f32 %v30_v4  ;;  %v35_v14 = vmul.f32 0.70710677, %v27_v12  ;;  %v36_v15 = vmul.f32 0.70710677, %v28_v13  ;;  %s91_s18 = sshll.u32 %s167_s0, 4  ;;  %s92_s18 = int_to_ptr.vmem [resolvable:$true] %s91_s18 }
  0x17   :  { %106 = verf.f32 %v31_v5  ;;  %s140_s19 = scalar_lea.vmem %s92_s18, 1024  ;;  %p145_p9 = scmp.lt.s32.totalorder %s92_s18, %s92_s18 }
  0x18   :  { %108 = verf.f32 %v32_v9  ;;  %p141_p8 = scmp.ne.s32.totalorder %s92_s18, %s140_s19  ;;  %p146_p10 = scmp.lt.s32.totalorder %s140_s19, %s140_s19 }
  0x19   :  { %110 = verf.f32 %v33_v10 }
  0x1a   :  { %112 = verf.f32 %v34_v11  ;;  %p147_p11 = por %p146_p10, %p145_p9 }
  0x1b   :  { %114 = verf.f32 %v35_v14 }
  0x1c   :  { %116 = verf.f32 %v36_v15  ;;  %p148_p12 = pnand %p147_p11, %p141_p8 }
  0x1f   :  { %v103_v16 = vpop.eup %102 }
  0x20   :  { %v105_v17 = vpop.eup %104  ;;  %v45_v18 = vadd.f32 1.0, %v103_v16 }
  0x21   :  { %v107_v19 = vpop.eup %106  ;;  %v46_v20 = vadd.f32 1.0, %v105_v17 }
  0x22   :  { %v109_v21 = vpop.eup %108  ;;  %v53_v22 = vmul.f32 0.5, %v45_v18  ;;  %v47_v23 = vadd.f32 1.0, %v107_v19 }
  0x23   :  { %v111_v24 = vpop.eup %110  ;;  %v54_v25 = vmul.f32 0.5, %v46_v20  ;;  %v48_v26 = vadd.f32 1.0, %v109_v21 }
  0x24   :  { %v113_v27 = vpop.eup %112  ;;  %v61_v28 = vmax.f32 %v53_v22, 1.1920929e-07  ;;  %v55_v29 = vmul.f32 0.5, %v47_v23  ;;  %v49_v30 = vadd.f32 1.0, %v111_v24 }
  0x25   :  { %v115_v31 = vpop.eup %114  ;;  %v62_v32 = vmax.f32 %v54_v25, 1.1920929e-07  ;;  %v56_v33 = vmul.f32 0.5, %v48_v26  ;;  %v50_v34 = vadd.f32 1.0, %v113_v27 }
  0x26   :  { %v117_v35 = vpop.eup %116  ;;  %v69_v36 = vmin.f32 %v61_v28, 0.9999999  ;;  %v63_v37 = vmax.f32 %v55_v29, 1.1920929e-07  ;;  %v57_v38 = vmul.f32 0.5, %v49_v30  ;;  %v51_v39 = vadd.f32 1.0, %v115_v31 }
  0x27   :  { %v70_v40 = vmin.f32 %v62_v32, 0.9999999  ;;  %v64_v41 = vmax.f32 %v56_v33, 1.1920929e-07  ;;  %v58_v42 = vmul.f32 0.5, %v50_v34  ;;  %v52_v43 = vadd.f32 1.0, %v117_v35 }
  0x28   :  { %77 = vst [vmem:[#allocation5] sm:$0xff] %v69_v36  ;;  %v71_v44 = vmin.f32 %v63_v37, 0.9999999  ;;  %v65_v45 = vmax.f32 %v57_v38, 1.1920929e-07  ;;  %v59_v46 = vmul.f32 0.5, %v51_v39 }
  0x29   :  { %78 = vst [vmem:[#allocation5 + $0x8] sm:$0xff] %v70_v40  ;;  %v72_v47 = vmin.f32 %v64_v41, 0.9999999  ;;  %v66_v48 = vmax.f32 %v58_v42, 1.1920929e-07  ;;  %v60_v49 = vmul.f32 0.5, %v52_v43 }
  0x2a   :  { %79 = vst [vmem:[#allocation5 + $0x10] sm:$0xff] %v71_v44  ;;  %v73_v50 = vmin.f32 %v65_v45, 0.9999999  ;;  %v67_v51 = vmax.f32 %v59_v46, 1.1920929e-07 }
  0x2b   :  { %80 = vst [vmem:[#allocation5 + $0x18] sm:$0xff] %v72_v47  ;;  %v74_v52 = vmin.f32 %v66_v48, 0.9999999  ;;  %v68_v53 = vmax.f32 %v60_v49, 1.1920929e-07 }
  0x2c   :  { %81 = vst [vmem:[#allocation5 + $0x20] sm:$0xff] %v73_v50  ;;  %v75_v54 = vmin.f32 %v67_v51, 0.9999999 }
  0x2d   :  { %82 = vst [vmem:[#allocation5 + $0x28] sm:$0xff] %v74_v52  ;;  %v76_v55 = vmin.f32 %v68_v53, 0.9999999 }
  0x2e   :  { %83 = vst [vmem:[#allocation5 + $0x30] sm:$0xff] %v75_v54 }
  0x2f   :  { %84 = vst [vmem:[#allocation5 + $0x38] sm:$0xff] %v76_v55 }
  0x30   :  { %151 = shalt.err (!%p148_p12)
}
  0x31   :  { %s152_s22 = scalar_lea.hbm %s203_s1, 1024 }
  0x32   :  { %p153_p13 = scmp.ne.s32.totalorder %s203_s1, %s152_s22  ;;  %p156_p0 = scmp.lt.u32.totalorder %s152_s22, %s203_s1 }
  0x34   :  { %p158_p1 = pnand %p156_p0, %p153_p13 }
  0x36   :  { %161 = shalt.err (!%p158_p1)
}
  0x37   :  { %94 = dma.vmem_to_hbm [thread:$0]  %s92_s18, 1024, %s203_s1, [#allocation4]  }
  0x38   :  { %164 = dma.done.wait [#allocation4], 1024  }
  0x39   :  { %165 = vsyncadd [#allocation4], 4294966272 }
  0x3a   :  { %98 = vsyncpa [#allocation3], 1 }
  0x3b   :  { %99 = vsyncpa [#allocation4], 1 }

</bundles_post_ra>
